<compile_context>
chip_gen: v7x
topology: tpu7x:2x2x1
jax: 0.10.0
libtpu: 0.0.40
codegen_flags: <defaults>
</compile_context>

<pallas_src>
import functools
import math

import jax
import jax.numpy as jnp
from jax.experimental import pallas as pl
from jax.experimental.pallas import tpu as pltpu


def _round_up(n, m):
    return ((n + m - 1) // m) * m


# ----------------------------------------------------------------------------
# Kernel
# ----------------------------------------------------------------------------
_LANE_CHUNK = 256   # lanes processed per inner step (falls back to 128)
_K_CHUNK = 32       # reduction rows per inner step (bounds vreg working set)


def _neighbor_kernel(x_ref, w_ref, b_ref, o_ref):
    """One (cout-tile, spatial-tile, batch-tile) block per grid step.

    x_ref: (Bt, K, Pt)   im2col'd input, K = KH*KW*Cin second-minor (VMEM)
    w_ref: (Cot, K, Pt)  packed per-position weights, K second-minor (VMEM)
    b_ref: (Cot, Pt)     bias                                         (VMEM)
    o_ref: (Bt, Cot, Pt) output                                       (VMEM)
    """
    bt, k, pt = x_ref.shape
    cot = w_ref.shape[0]

    lc = _LANE_CHUNK if pt % _LANE_CHUNK == 0 else 128      # divides pt (pt % 128 == 0)
    k_starts = list(range(0, k, _K_CHUNK))
    # Hold the x lane-column in registers across the cout loop only when it is
    # small enough (bounds register pressure for large K).
    hoist_x = (_round_up(k, 8) // 8) * (lc // 128) <= 16

    for b in range(bt):                       # static unroll; bt is capped small
        for p0 in range(0, pt, lc):
            psl = pl.ds(p0, lc)
            if hoist_x:
                x_chunks = [
                    x_ref[b, pl.ds(k0, min(_K_CHUNK, k - k0)), psl].astype(jnp.float32)
                    for k0 in k_starts
                ]
            for co in range(cot):
                # fp32 row accumulator, initialized from the bias, stored ONCE.
                acc = b_ref[pl.ds(co, 1), psl].astype(jnp.float32)     # (1, lc)
                for idx, k0 in enumerate(k_starts):
                    kk = min(_K_CHUNK, k - k0)
                    if hoist_x:
                        xc = x_chunks[idx]                              # (kk, lc)
                    else:
                        xc = x_ref[b, pl.ds(k0, kk), psl].astype(jnp.float32)
                    wc = w_ref[co, pl.ds(k0, kk), psl].astype(jnp.float32)
                    # VPU multiply + sublane reduction (XLU); no broadcast temps.
                    acc = acc + jnp.sum(xc * wc, axis=0, keepdims=True)
                o_ref[b, pl.ds(co, 1), psl] = acc.astype(o_ref.dtype)


# ----------------------------------------------------------------------------
# Hardware query + tile selection
# ----------------------------------------------------------------------------
def _hw_info():
    """Best-effort (VMEM capacity, TensorCores per chip); conservative fallback."""
    vmem_cap = 64 * 1024 * 1024      # v7x physical VMEM = the smallest generation
    ncores = 1
    try:
        info = pltpu.get_tpu_info()
        cap = getattr(info, "vmem_capacity_bytes", None)
        if cap:
            vmem_cap = int(cap)
        for name in ("num_cores", "num_tensorcores", "tensorcore_count",
                     "cores_per_chip"):
            v = getattr(info, name, None)
            if isinstance(v, int) and v > 0:
                ncores = v
                break
    except Exception:
        pass
    return vmem_cap, ncores


def _p_tile_candidates(ppad):
    nblk = ppad // 128
    return [128 * d for d in range(nblk, 0, -1) if nblk % d == 0]


def _cout_tile_candidates(cout, cap=32):
    # Block second-minor dim of bias/out must be == Cout or a multiple of 8.
    cands = []
    if cout <= cap:
        cands.append(cout)
    if cout % 8 == 0:
        c = (min(cout, cap) // 8) * 8
        while c >= 8:
            if cout % c == 0 and c not in cands:
                cands.append(c)
            c -= 8
    if not cands:
        cands.append(cout)
    return sorted(set(cands), reverse=True)


def _b_tile_candidates(b, cap=8):
    return [d for d in range(min(b, cap), 0, -1) if b % d == 0]


def _block_bytes(bt, ct, pt, k, x_isz, w_isz, o_isz):
    """VMEM bytes for one set of blocks, including sublane padding of the
    second-minor dims (K and Cout-tile)."""
    k8 = _round_up(k, 8)
    c8 = _round_up(ct, 8)
    return (bt * k8 * pt * x_isz          # x block
            + ct * k8 * pt * w_isz        # weight block
            + c8 * pt * 4                 # bias block (fp32)
            + bt * c8 * pt * o_isz)       # output block


def _choose_tiles(b, cout, k, ppad, x_isz, w_isz, o_isz, vmem_cap, ncores):
    budget = int(vmem_cap * 0.45)         # double-buffered working-set target
    p_cands = _p_tile_candidates(ppad)
    c_cands = _cout_tile_candidates(cout)
    b_cands = _b_tile_candidates(b)

    bt, ct, pt = b_cands[-1], c_cands[-1], p_cands[-1]   # smallest legal fallback
    done = False
    for ct_ in c_cands:                   # large Cout tile first: fewest x re-fetches
        for pt_ in p_cands:               # then large lane-dense spatial tile
            for bt_ in b_cands:
                if 2 * _block_bytes(bt_, ct_, pt_, k, x_isz, w_isz, o_isz) <= budget:
                    bt, ct, pt = bt_, ct_, pt_
                    done = True
                    break
            if done:
                break
        if done:
            break

    # Only multi-TensorCore chips (v7x) need >= 2 steps per core on the
    # parallel axes; on 1-TC chips the grid is a serial loop and splitting a
    # memory-bound problem only adds per-step overhead.
    if ncores > 1:
        def par_steps(ct_, pt_):
            return (cout // ct_) * (ppad // pt_)
        pi = p_cands.index(pt)
        while par_steps(ct, pt) < 2 * ncores and pi + 1 < len(p_cands):
            pi += 1
            pt = p_cands[pi]
        ci = c_cands.index(ct)
        while par_steps(ct, pt) < 2 * ncores and ci + 1 < len(c_cands):
            ci += 1
            ct = c_cands[ci]
    return bt, ct, pt


# ----------------------------------------------------------------------------
# Parameter packing (do ONCE at parameter-creation time, not per call)
# ----------------------------------------------------------------------------
def pack_neighbor_params(weight, bias, dtype=None):
    """weight [Cin,Cout,OH,OW,KH,KW] -> [Cout, K, Ppad]  (K = KH*KW*Cin second-minor);
       bias   [Cout,OH,OW]           -> [Cout, Ppad]     (Ppad = OH*OW up to x128).

    `dtype=jnp.bfloat16` halves weight HBM traffic (v6e/v7x); accumulation stays
    fp32 in-kernel.  Bias is kept fp32 (tiny; seeds the fp32 accumulator exactly).
    """
    cin, cout, oh, ow, kh, kw = weight.shape
    p = oh * ow
    ppad = _round_up(p, 128)
    w = jnp.transpose(weight, (1, 4, 5, 0, 2, 3)).reshape(cout, kh * kw * cin, p)
    w = jnp.pad(w, ((0, 0), (0, 0), (0, ppad - p)))
    if dtype is not None:
        w = w.astype(dtype)
    bvec = jnp.pad(bias.reshape(cout, p), ((0, 0), (0, ppad - p)))
    return w, bvec


def _im2col_fold(x, kh, kw, oh, ow, stride, ppad):
    """[B, Cin, H, W] -> [B, K, Ppad] with K = KH*KW*Cin (tap-major, then Cin)."""
    b, cin, _, _ = x.shape
    s0, s1 = stride
    p = oh * ow
    taps = []
    for i in range(kh):
        for j in range(kw):
            taps.append(x[:, :, i:i + oh * s0:s0, j:j + ow * s1:s1].reshape(b, cin, p))
    xt = jnp.stack(taps, axis=1).reshape(b, kh * kw * cin, p)     # (B, K, P)
    return jnp.pad(xt, ((0, 0), (0, 0), (0, ppad - p)))


# ----------------------------------------------------------------------------
# Forward pass
# ----------------------------------------------------------------------------
def neighbor_connected_2d(x, w_packed, b_packed, *, kernel_size, stride=(1, 1),
                          out_dtype=None):
    """Pallas forward pass of NeighborLayer2D.

    x:        [B, Cin, H, W]
    w_packed: [Cout, K, Ppad]   (from pack_neighbor_params; K = KH*KW*Cin)
    b_packed: [Cout, Ppad]
    returns   [B, Cout, OH, OW]
    """
    b, cin, h, w = x.shape
    kh, kw = kernel_size
    s0, s1 = stride
    oh = (h - kh + 1) // s0
    ow = (w - kw + 1) // s1
    p = oh * ow
    ppad = _round_up(p, 128)
    k = kh * kw * cin

    cout, k_w, ppad_w = w_packed.shape
    assert k_w == k and ppad_w == ppad
    assert b_packed.shape == (cout, ppad)

    out_dtype = out_dtype or x.dtype

    # Wrapper-side im2col: aligned, lane-dense, K-second-minor input taps.
    x_fold = _im2col_fold(x, kh, kw, oh, ow, (s0, s1), ppad)      # (B, K, Ppad)

    x_isz = jnp.dtype(x_fold.dtype).itemsize
    w_isz = jnp.dtype(w_packed.dtype).itemsize
    o_isz = jnp.dtype(out_dtype).itemsize

    vmem_cap, ncores = _hw_info()
    bt, ct, pt = _choose_tiles(b, cout, k, ppad, x_isz, w_isz, o_isz,
                               vmem_cap, ncores)

    # Batch axis INNERMOST + "arbitrary": weight/bias block indices are
    # invariant in it, so Pallas fetches them exactly once per (ci, pi).
    grid = (cout // ct, ppad // pt, b // bt)

    flops = 2 * b * cout * p * k
    bytes_accessed = int(x_fold.size * x_isz + w_packed.size * w_isz
                         + b_packed.size * jnp.dtype(b_packed.dtype).itemsize
                         + b * cout * ppad * o_isz)

    out = pl.pallas_call(
        _neighbor_kernel,
        out_shape=jax.ShapeDtypeStruct((b, cout, ppad), out_dtype),
        grid_spec=pltpu.PrefetchScalarGridSpec(
            num_scalar_prefetch=0,
            grid=grid,
            in_specs=[
                pl.BlockSpec((bt, k, pt), lambda ci, pi, bi: (bi, 0, pi)),   # x
                pl.BlockSpec((ct, k, pt), lambda ci, pi, bi: (ci, 0, pi)),   # W (no re-fetch over bi)
                pl.BlockSpec((ct, pt), lambda ci, pi, bi: (ci, pi)),         # bias
            ],
            out_specs=pl.BlockSpec((bt, ct, pt), lambda ci, pi, bi: (bi, ci, pi)),
        ),
        compiler_params=pltpu.CompilerParams(
            dimension_semantics=("parallel", "parallel", "arbitrary"),
            vmem_limit_bytes=int(vmem_cap * 0.75),
        ),
        cost_estimate=pl.CostEstimate(flops=int(flops), transcendentals=0,
                                      bytes_accessed=bytes_accessed),
    )(x_fold, w_packed, b_packed)

    # Drop zero-padded lanes and restore (OH, OW).
    return out[:, :, :p].reshape(b, cout, oh, ow)


def neighbor_connected_2d_from_module_params(x, weight, bias, stride=(1, 1),
                                             weight_dtype=None):
    """Convenience path taking PyTorch-layout params (packing should normally
    be hoisted to parameter creation, not done per forward call)."""
    kh, kw = weight.shape[4], weight.shape[5]
    w_packed, b_packed = pack_neighbor_params(weight, bias, dtype=weight_dtype)
    return neighbor_connected_2d(x, w_packed, b_packed,
                                 kernel_size=(kh, kw), stride=stride)


def neighbor_connected_2d_ref(x, weight, bias, stride=(1, 1)):
    """Plain-JAX reference (mirrors the PyTorch loop) for validation."""
    _, _, OH, OW, KH, KW = weight.shape
    s0, s1 = stride
    out = jnp.broadcast_to(bias[None], (x.shape[0],) + bias.shape)
    for i in range(KH):
        for j in range(KW):
            patch = x[:, :, i:i + OH * s0:s0, j:j + OW * s1:s1]       # (B,Cin,OH,OW)
            w_ij = weight[:, :, :, :, i, j]                           # (Cin,Cout,OH,OW)
            out = out + jnp.einsum("bchw,cohw->bohw", patch, w_ij)
    return out


if __name__ == "__main__":
    # Module config (matches NeighborLayer2D.__init__)
    batch = 2
    in_channels = 4
    out_channels = 4
    image_shape = (16, 16)
    kernel_size = (3, 3)
    stride = (1, 1)

    H, W = image_shape
    KH, KW = kernel_size
    OH = (H - KH + 1) // stride[0]
    OW = (W - KW + 1) // stride[1]

    # Deterministic parameter init (uniform(-stdv, stdv), as in reset_parameters)
    n = in_channels * KH * KW
    stdv = 1.0 / math.sqrt(n)
    key = jax.random.PRNGKey(0)
    kx, kw_, kb = jax.random.split(key, 3)

    x = jax.random.normal(kx, (batch, in_channels, H, W), dtype=jnp.float32)
    weight = jax.random.uniform(
        kw_, (in_channels, out_channels, OH, OW, KH, KW),
        minval=-stdv, maxval=stdv, dtype=jnp.float32)
    bias = jax.random.uniform(
        kb, (out_channels, OH, OW), minval=-stdv, maxval=stdv, dtype=jnp.float32)

    ref = neighbor_connected_2d_ref(x, weight, bias, stride)

    fwd = jax.jit(functools.partial(
        neighbor_connected_2d, kernel_size=kernel_size, stride=stride))

    # --- fp32 path (strict check against the fp32 reference) ---
    w_packed, b_packed = jax.block_until_ready(pack_neighbor_params(weight, bias))
    out = jax.block_until_ready(fwd(x, w_packed, b_packed))
    assert out.shape == (batch, out_channels, OH, OW)
    assert jnp.allclose(out, ref, atol=1e-5, rtol=1e-5)

    # --- bf16 weights (halved weight HBM traffic on v6e/v7x), fp32 accumulation ---
    w_bf16, b_bf16 = jax.block_until_ready(
        pack_neighbor_params(weight, bias, dtype=jnp.bfloat16))
    out_bf16 = jax.block_until_ready(fwd(x, w_bf16, b_bf16))
    assert jnp.allclose(out_bf16, ref, atol=5e-2, rtol=5e-2)

    print("KERNEL_OK")
</pallas_src>

<mosaic_0001>
module attributes {stable_mosaic.version = 11 : i64} {
  func.func @_neighbor_kernel(%arg0: i32, %arg1: i32, %arg2: i32, %arg3: memref<2x36x256xf32, #tpu.memory_space<vmem>>, %arg4: memref<4x36x256xf32, #tpu.memory_space<vmem>>, %arg5: memref<4x256xf32, #tpu.memory_space<vmem>>, %arg6: memref<2x4x256xf32, #tpu.memory_space<vmem>>) attributes {dimension_semantics = [#tpu.dimension_semantics<parallel>, #tpu.dimension_semantics<parallel>, #tpu.dimension_semantics<arbitrary>], iteration_bounds = array<i64: 1, 1, 1>, scalar_prefetch = 0 : i64, scratch_operands = 0 : i64, tpu.core_type = #tpu.core_type<tc>, window_params = [{transform_indices = @transform_0, window_bounds = array<i64: 2, 36, 256>}, {transform_indices = @transform_1, window_bounds = array<i64: 4, 36, 256>}, {transform_indices = @transform_2, window_bounds = array<i64: 4, 256>}, {transform_indices = @transform_3, window_bounds = array<i64: 2, 4, 256>}]} {
    %c0 = arith.constant 0 : index
    %c0_0 = arith.constant 0 : index
    %c0_1 = arith.constant 0 : index
    %0 = vector.load %arg3[%c0, %c0_0, %c0_1] : memref<2x36x256xf32, #tpu.memory_space<vmem>>, vector<1x32x256xf32>
    %1 = vector.shape_cast %0 : vector<1x32x256xf32> to vector<32x256xf32>
    %c0_2 = arith.constant 0 : index
    %c32 = arith.constant 32 : index
    %c0_3 = arith.constant 0 : index
    %2 = vector.load %arg3[%c0_2, %c32, %c0_3] : memref<2x36x256xf32, #tpu.memory_space<vmem>>, vector<1x4x256xf32>
    %3 = vector.shape_cast %2 : vector<1x4x256xf32> to vector<4x256xf32>
    %c0_4 = arith.constant 0 : index
    %c0_5 = arith.constant 0 : index
    %4 = vector.load %arg5[%c0_4, %c0_5] : memref<4x256xf32, #tpu.memory_space<vmem>>, vector<1x256xf32>
    %c0_6 = arith.constant 0 : index
    %c0_7 = arith.constant 0 : index
    %c0_8 = arith.constant 0 : index
    %5 = vector.load %arg4[%c0_6, %c0_7, %c0_8] : memref<4x36x256xf32, #tpu.memory_space<vmem>>, vector<1x32x256xf32>
    %6 = vector.shape_cast %5 : vector<1x32x256xf32> to vector<32x256xf32>
    %7 = arith.mulf %1, %6 : vector<32x256xf32>
    %cst = arith.constant dense<0.000000e+00> : vector<256xf32>
    %8 = vector.multi_reduction <add>, %7, %cst [0] : vector<32x256xf32> to vector<256xf32>
    %9 = vector.shape_cast %8 : vector<256xf32> to vector<1x256xf32>
    %10 = arith.addf %4, %9 : vector<1x256xf32>
    %c0_9 = arith.constant 0 : index
    %c32_10 = arith.constant 32 : index
    %c0_11 = arith.constant 0 : index
    %11 = vector.load %arg4[%c0_9, %c32_10, %c0_11] : memref<4x36x256xf32, #tpu.memory_space<vmem>>, vector<1x4x256xf32>
    %12 = vector.shape_cast %11 : vector<1x4x256xf32> to vector<4x256xf32>
    %13 = arith.mulf %3, %12 : vector<4x256xf32>
    %cst_12 = arith.constant dense<0.000000e+00> : vector<256xf32>
    %14 = vector.multi_reduction <add>, %13, %cst_12 [0] : vector<4x256xf32> to vector<256xf32>
    %15 = vector.shape_cast %14 : vector<256xf32> to vector<1x256xf32>
    %16 = arith.addf %10, %15 : vector<1x256xf32>
    %c0_13 = arith.constant 0 : index
    %c0_14 = arith.constant 0 : index
    %c0_15 = arith.constant 0 : index
    %17 = vector.load %arg6[%c0_13, %c0_14, %c0_15] : memref<2x4x256xf32, #tpu.memory_space<vmem>>, vector<1x1x256xf32>
    %18 = vector.shape_cast %17 : vector<1x1x256xf32> to vector<1x256xf32>
    %19 = vector.shape_cast %16 : vector<1x256xf32> to vector<1x1x256xf32>
    tpu.vector_store %arg6[%c0_13, %c0_14, %c0_15], %19 {strides = array<i32>} : memref<2x4x256xf32, #tpu.memory_space<vmem>>, vector<1x1x256xf32>,
    %c1 = arith.constant 1 : index
    %c0_16 = arith.constant 0 : index
    %20 = vector.load %arg5[%c1, %c0_16] : memref<4x256xf32, #tpu.memory_space<vmem>>, vector<1x256xf32>
    %c1_17 = arith.constant 1 : index
    %c0_18 = arith.constant 0 : index
    %c0_19 = arith.constant 0 : index
    %21 = vector.load %arg4[%c1_17, %c0_18, %c0_19] : memref<4x36x256xf32, #tpu.memory_space<vmem>>, vector<1x32x256xf32>
    %22 = vector.shape_cast %21 : vector<1x32x256xf32> to vector<32x256xf32>
    %23 = arith.mulf %1, %22 : vector<32x256xf32>
    %cst_20 = arith.constant dense<0.000000e+00> : vector<256xf32>
    %24 = vector.multi_reduction <add>, %23, %cst_20 [0] : vector<32x256xf32> to vector<256xf32>
    %25 = vector.shape_cast %24 : vector<256xf32> to vector<1x256xf32>
    %26 = arith.addf %20, %25 : vector<1x256xf32>
    %c1_21 = arith.constant 1 : index
    %c32_22 = arith.constant 32 : index
    %c0_23 = arith.constant 0 : index
    %27 = vector.load %arg4[%c1_21, %c32_22, %c0_23] : memref<4x36x256xf32, #tpu.memory_space<vmem>>, vector<1x4x256xf32>
    %28 = vector.shape_cast %27 : vector<1x4x256xf32> to vector<4x256xf32>
    %29 = arith.mulf %3, %28 : vector<4x256xf32>
    %cst_24 = arith.constant dense<0.000000e+00> : vector<256xf32>
    %30 = vector.multi_reduction <add>, %29, %cst_24 [0] : vector<4x256xf32> to vector<256xf32>
    %31 = vector.shape_cast %30 : vector<256xf32> to vector<1x256xf32>
    %32 = arith.addf %26, %31 : vector<1x256xf32>
    %c0_25 = arith.constant 0 : index
    %c1_26 = arith.constant 1 : index
    %c0_27 = arith.constant 0 : index
    %33 = vector.load %arg6[%c0_25, %c1_26, %c0_27] : memref<2x4x256xf32, #tpu.memory_space<vmem>>, vector<1x1x256xf32>
    %34 = vector.shape_cast %33 : vector<1x1x256xf32> to vector<1x256xf32>
    %35 = vector.shape_cast %32 : vector<1x256xf32> to vector<1x1x256xf32>
    tpu.vector_store %arg6[%c0_25, %c1_26, %c0_27], %35 {strides = array<i32>} : memref<2x4x256xf32, #tpu.memory_space<vmem>>, vector<1x1x256xf32>,
    %c2 = arith.constant 2 : index
    %c0_28 = arith.constant 0 : index
    %36 = vector.load %arg5[%c2, %c0_28] : memref<4x256xf32, #tpu.memory_space<vmem>>, vector<1x256xf32>
    %c2_29 = arith.constant 2 : index
    %c0_30 = arith.constant 0 : index
    %c0_31 = arith.constant 0 : index
    %37 = vector.load %arg4[%c2_29, %c0_30, %c0_31] : memref<4x36x256xf32, #tpu.memory_space<vmem>>, vector<1x32x256xf32>
    %38 = vector.shape_cast %37 : vector<1x32x256xf32> to vector<32x256xf32>
    %39 = arith.mulf %1, %38 : vector<32x256xf32>
    %cst_32 = arith.constant dense<0.000000e+00> : vector<256xf32>
    %40 = vector.multi_reduction <add>, %39, %cst_32 [0] : vector<32x256xf32> to vector<256xf32>
    %41 = vector.shape_cast %40 : vector<256xf32> to vector<1x256xf32>
    %42 = arith.addf %36, %41 : vector<1x256xf32>
    %c2_33 = arith.constant 2 : index
    %c32_34 = arith.constant 32 : index
    %c0_35 = arith.constant 0 : index
    %43 = vector.load %arg4[%c2_33, %c32_34, %c0_35] : memref<4x36x256xf32, #tpu.memory_space<vmem>>, vector<1x4x256xf32>
    %44 = vector.shape_cast %43 : vector<1x4x256xf32> to vector<4x256xf32>
    %45 = arith.mulf %3, %44 : vector<4x256xf32>
    %cst_36 = arith.constant dense<0.000000e+00> : vector<256xf32>
    %46 = vector.multi_reduction <add>, %45, %cst_36 [0] : vector<4x256xf32> to vector<256xf32>
    %47 = vector.shape_cast %46 : vector<256xf32> to vector<1x256xf32>
    %48 = arith.addf %42, %47 : vector<1x256xf32>
    %c0_37 = arith.constant 0 : index
    %c2_38 = arith.constant 2 : index
    %c0_39 = arith.constant 0 : index
    %49 = vector.load %arg6[%c0_37, %c2_38, %c0_39] : memref<2x4x256xf32, #tpu.memory_space<vmem>>, vector<1x1x256xf32>
    %50 = vector.shape_cast %49 : vector<1x1x256xf32> to vector<1x256xf32>
    %51 = vector.shape_cast %48 : vector<1x256xf32> to vector<1x1x256xf32>
    tpu.vector_store %arg6[%c0_37, %c2_38, %c0_39], %51 {strides = array<i32>} : memref<2x4x256xf32, #tpu.memory_space<vmem>>, vector<1x1x256xf32>,
    %c3 = arith.constant 3 : index
    %c0_40 = arith.constant 0 : index
    %52 = vector.load %arg5[%c3, %c0_40] : memref<4x256xf32, #tpu.memory_space<vmem>>, vector<1x256xf32>
    %c3_41 = arith.constant 3 : index
    %c0_42 = arith.constant 0 : index
    %c0_43 = arith.constant 0 : index
    %53 = vector.load %arg4[%c3_41, %c0_42, %c0_43] : memref<4x36x256xf32, #tpu.memory_space<vmem>>, vector<1x32x256xf32>
    %54 = vector.shape_cast %53 : vector<1x32x256xf32> to vector<32x256xf32>
    %55 = arith.mulf %1, %54 : vector<32x256xf32>
    %cst_44 = arith.constant dense<0.000000e+00> : vector<256xf32>
    %56 = vector.multi_reduction <add>, %55, %cst_44 [0] : vector<32x256xf32> to vector<256xf32>
    %57 = vector.shape_cast %56 : vector<256xf32> to vector<1x256xf32>
    %58 = arith.addf %52, %57 : vector<1x256xf32>
    %c3_45 = arith.constant 3 : index
    %c32_46 = arith.constant 32 : index
    %c0_47 = arith.constant 0 : index
    %59 = vector.load %arg4[%c3_45, %c32_46, %c0_47] : memref<4x36x256xf32, #tpu.memory_space<vmem>>, vector<1x4x256xf32>
    %60 = vector.shape_cast %59 : vector<1x4x256xf32> to vector<4x256xf32>
    %61 = arith.mulf %3, %60 : vector<4x256xf32>
    %cst_48 = arith.constant dense<0.000000e+00> : vector<256xf32>
    %62 = vector.multi_reduction <add>, %61, %cst_48 [0] : vector<4x256xf32> to vector<256xf32>
    %63 = vector.shape_cast %62 : vector<256xf32> to vector<1x256xf32>
    %64 = arith.addf %58, %63 : vector<1x256xf32>
    %c0_49 = arith.constant 0 : index
    %c3_50 = arith.constant 3 : index
    %c0_51 = arith.constant 0 : index
    %65 = vector.load %arg6[%c0_49, %c3_50, %c0_51] : memref<2x4x256xf32, #tpu.memory_space<vmem>>, vector<1x1x256xf32>
    %66 = vector.shape_cast %65 : vector<1x1x256xf32> to vector<1x256xf32>
    %67 = vector.shape_cast %64 : vector<1x256xf32> to vector<1x1x256xf32>
    tpu.vector_store %arg6[%c0_49, %c3_50, %c0_51], %67 {strides = array<i32>} : memref<2x4x256xf32, #tpu.memory_space<vmem>>, vector<1x1x256xf32>,
    %c1_52 = arith.constant 1 : index
    %c0_53 = arith.constant 0 : index
    %c0_54 = arith.constant 0 : index
    %68 = vector.load %arg3[%c1_52, %c0_53, %c0_54] : memref<2x36x256xf32, #tpu.memory_space<vmem>>, vector<1x32x256xf32>
    %69 = vector.shape_cast %68 : vector<1x32x256xf32> to vector<32x256xf32>
    %c1_55 = arith.constant 1 : index
    %c32_56 = arith.constant 32 : index
    %c0_57 = arith.constant 0 : index
    %70 = vector.load %arg3[%c1_55, %c32_56, %c0_57] : memref<2x36x256xf32, #tpu.memory_space<vmem>>, vector<1x4x256xf32>
    %71 = vector.shape_cast %70 : vector<1x4x256xf32> to vector<4x256xf32>
    %c0_58 = arith.constant 0 : index
    %c0_59 = arith.constant 0 : index
    %72 = vector.load %arg5[%c0_58, %c0_59] : memref<4x256xf32, #tpu.memory_space<vmem>>, vector<1x256xf32>
    %c0_60 = arith.constant 0 : index
    %c0_61 = arith.constant 0 : index
    %c0_62 = arith.constant 0 : index
    %73 = vector.load %arg4[%c0_60, %c0_61, %c0_62] : memref<4x36x256xf32, #tpu.memory_space<vmem>>, vector<1x32x256xf32>
    %74 = vector.shape_cast %73 : vector<1x32x256xf32> to vector<32x256xf32>
    %75 = arith.mulf %69, %74 : vector<32x256xf32>
    %cst_63 = arith.constant dense<0.000000e+00> : vector<256xf32>
    %76 = vector.multi_reduction <add>, %75, %cst_63 [0] : vector<32x256xf32> to vector<256xf32>
    %77 = vector.shape_cast %76 : vector<256xf32> to vector<1x256xf32>
    %78 = arith.addf %72, %77 : vector<1x256xf32>
    %c0_64 = arith.constant 0 : index
    %c32_65 = arith.constant 32 : index
    %c0_66 = arith.constant 0 : index
    %79 = vector.load %arg4[%c0_64, %c32_65, %c0_66] : memref<4x36x256xf32, #tpu.memory_space<vmem>>, vector<1x4x256xf32>
    %80 = vector.shape_cast %79 : vector<1x4x256xf32> to vector<4x256xf32>
    %81 = arith.mulf %71, %80 : vector<4x256xf32>
    %cst_67 = arith.constant dense<0.000000e+00> : vector<256xf32>
    %82 = vector.multi_reduction <add>, %81, %cst_67 [0] : vector<4x256xf32> to vector<256xf32>
    %83 = vector.shape_cast %82 : vector<256xf32> to vector<1x256xf32>
    %84 = arith.addf %78, %83 : vector<1x256xf32>
    %c1_68 = arith.constant 1 : index
    %c0_69 = arith.constant 0 : index
    %c0_70 = arith.constant 0 : index
    %85 = vector.load %arg6[%c1_68, %c0_69, %c0_70] : memref<2x4x256xf32, #tpu.memory_space<vmem>>, vector<1x1x256xf32>
    %86 = vector.shape_cast %85 : vector<1x1x256xf32> to vector<1x256xf32>
    %87 = vector.shape_cast %84 : vector<1x256xf32> to vector<1x1x256xf32>
    tpu.vector_store %arg6[%c1_68, %c0_69, %c0_70], %87 {strides = array<i32>} : memref<2x4x256xf32, #tpu.memory_space<vmem>>, vector<1x1x256xf32>,
    %c1_71 = arith.constant 1 : index
    %c0_72 = arith.constant 0 : index
    %88 = vector.load %arg5[%c1_71, %c0_72] : memref<4x256xf32, #tpu.memory_space<vmem>>, vector<1x256xf32>
    %c1_73 = arith.constant 1 : index
    %c0_74 = arith.constant 0 : index
    %c0_75 = arith.constant 0 : index
    %89 = vector.load %arg4[%c1_73, %c0_74, %c0_75] : memref<4x36x256xf32, #tpu.memory_space<vmem>>, vector<1x32x256xf32>
    %90 = vector.shape_cast %89 : vector<1x32x256xf32> to vector<32x256xf32>
    %91 = arith.mulf %69, %90 : vector<32x256xf32>
    %cst_76 = arith.constant dense<0.000000e+00> : vector<256xf32>
    %92 = vector.multi_reduction <add>, %91, %cst_76 [0] : vector<32x256xf32> to vector<256xf32>
    %93 = vector.shape_cast %92 : vector<256xf32> to vector<1x256xf32>
    %94 = arith.addf %88, %93 : vector<1x256xf32>
    %c1_77 = arith.constant 1 : index
    %c32_78 = arith.constant 32 : index
    %c0_79 = arith.constant 0 : index
    %95 = vector.load %arg4[%c1_77, %c32_78, %c0_79] : memref<4x36x256xf32, #tpu.memory_space<vmem>>, vector<1x4x256xf32>
    %96 = vector.shape_cast %95 : vector<1x4x256xf32> to vector<4x256xf32>
    %97 = arith.mulf %71, %96 : vector<4x256xf32>
    %cst_80 = arith.constant dense<0.000000e+00> : vector<256xf32>
    %98 = vector.multi_reduction <add>, %97, %cst_80 [0] : vector<4x256xf32> to vector<256xf32>
    %99 = vector.shape_cast %98 : vector<256xf32> to vector<1x256xf32>
    %100 = arith.addf %94, %99 : vector<1x256xf32>
    %c1_81 = arith.constant 1 : index
    %c1_82 = arith.constant 1 : index
    %c0_83 = arith.constant 0 : index
    %101 = vector.load %arg6[%c1_81, %c1_82, %c0_83] : memref<2x4x256xf32, #tpu.memory_space<vmem>>, vector<1x1x256xf32>
    %102 = vector.shape_cast %101 : vector<1x1x256xf32> to vector<1x256xf32>
    %103 = vector.shape_cast %100 : vector<1x256xf32> to vector<1x1x256xf32>
    tpu.vector_store %arg6[%c1_81, %c1_82, %c0_83], %103 {strides = array<i32>} : memref<2x4x256xf32, #tpu.memory_space<vmem>>, vector<1x1x256xf32>,
    %c2_84 = arith.constant 2 : index
    %c0_85 = arith.constant 0 : index
    %104 = vector.load %arg5[%c2_84, %c0_85] : memref<4x256xf32, #tpu.memory_space<vmem>>, vector<1x256xf32>
    %c2_86 = arith.constant 2 : index
    %c0_87 = arith.constant 0 : index
    %c0_88 = arith.constant 0 : index
    %105 = vector.load %arg4[%c2_86, %c0_87, %c0_88] : memref<4x36x256xf32, #tpu.memory_space<vmem>>, vector<1x32x256xf32>
    %106 = vector.shape_cast %105 : vector<1x32x256xf32> to vector<32x256xf32>
    %107 = arith.mulf %69, %106 : vector<32x256xf32>
    %cst_89 = arith.constant dense<0.000000e+00> : vector<256xf32>
    %108 = vector.multi_reduction <add>, %107, %cst_89 [0] : vector<32x256xf32> to vector<256xf32>
    %109 = vector.shape_cast %108 : vector<256xf32> to vector<1x256xf32>
    %110 = arith.addf %104, %109 : vector<1x256xf32>
    %c2_90 = arith.constant 2 : index
    %c32_91 = arith.constant 32 : index
    %c0_92 = arith.constant 0 : index
    %111 = vector.load %arg4[%c2_90, %c32_91, %c0_92] : memref<4x36x256xf32, #tpu.memory_space<vmem>>, vector<1x4x256xf32>
    %112 = vector.shape_cast %111 : vector<1x4x256xf32> to vector<4x256xf32>
    %113 = arith.mulf %71, %112 : vector<4x256xf32>
    %cst_93 = arith.constant dense<0.000000e+00> : vector<256xf32>
    %114 = vector.multi_reduction <add>, %113, %cst_93 [0] : vector<4x256xf32> to vector<256xf32>
    %115 = vector.shape_cast %114 : vector<256xf32> to vector<1x256xf32>
    %116 = arith.addf %110, %115 : vector<1x256xf32>
    %c1_94 = arith.constant 1 : index
    %c2_95 = arith.constant 2 : index
    %c0_96 = arith.constant 0 : index
    %117 = vector.load %arg6[%c1_94, %c2_95, %c0_96] : memref<2x4x256xf32, #tpu.memory_space<vmem>>, vector<1x1x256xf32>
    %118 = vector.shape_cast %117 : vector<1x1x256xf32> to vector<1x256xf32>
    %119 = vector.shape_cast %116 : vector<1x256xf32> to vector<1x1x256xf32>
    tpu.vector_store %arg6[%c1_94, %c2_95, %c0_96], %119 {strides = array<i32>} : memref<2x4x256xf32, #tpu.memory_space<vmem>>, vector<1x1x256xf32>,
    %c3_97 = arith.constant 3 : index
    %c0_98 = arith.constant 0 : index
    %120 = vector.load %arg5[%c3_97, %c0_98] : memref<4x256xf32, #tpu.memory_space<vmem>>, vector<1x256xf32>
    %c3_99 = arith.constant 3 : index
    %c0_100 = arith.constant 0 : index
    %c0_101 = arith.constant 0 : index
    %121 = vector.load %arg4[%c3_99, %c0_100, %c0_101] : memref<4x36x256xf32, #tpu.memory_space<vmem>>, vector<1x32x256xf32>
    %122 = vector.shape_cast %121 : vector<1x32x256xf32> to vector<32x256xf32>
    %123 = arith.mulf %69, %122 : vector<32x256xf32>
    %cst_102 = arith.constant dense<0.000000e+00> : vector<256xf32>
    %124 = vector.multi_reduction <add>, %123, %cst_102 [0] : vector<32x256xf32> to vector<256xf32>
    %125 = vector.shape_cast %124 : vector<256xf32> to vector<1x256xf32>
    %126 = arith.addf %120, %125 : vector<1x256xf32>
    %c3_103 = arith.constant 3 : index
    %c32_104 = arith.constant 32 : index
    %c0_105 = arith.constant 0 : index
    %127 = vector.load %arg4[%c3_103, %c32_104, %c0_105] : memref<4x36x256xf32, #tpu.memory_space<vmem>>, vector<1x4x256xf32>
    %128 = vector.shape_cast %127 : vector<1x4x256xf32> to vector<4x256xf32>
    %129 = arith.mulf %71, %128 : vector<4x256xf32>
    %cst_106 = arith.constant dense<0.000000e+00> : vector<256xf32>
    %130 = vector.multi_reduction <add>, %129, %cst_106 [0] : vector<4x256xf32> to vector<256xf32>
    %131 = vector.shape_cast %130 : vector<256xf32> to vector<1x256xf32>
    %132 = arith.addf %126, %131 : vector<1x256xf32>
    %c1_107 = arith.constant 1 : index
    %c3_108 = arith.constant 3 : index
    %c0_109 = arith.constant 0 : index
    %133 = vector.load %arg6[%c1_107, %c3_108, %c0_109] : memref<2x4x256xf32, #tpu.memory_space<vmem>>, vector<1x1x256xf32>
    %134 = vector.shape_cast %133 : vector<1x1x256xf32> to vector<1x256xf32>
    %135 = vector.shape_cast %132 : vector<1x256xf32> to vector<1x1x256xf32>
    tpu.vector_store %arg6[%c1_107, %c3_108, %c0_109], %135 {strides = array<i32>} : memref<2x4x256xf32, #tpu.memory_space<vmem>>, vector<1x1x256xf32>,
    return
  }
  func.func @transform_0(%arg0: i32, %arg1: i32, %arg2: i32) -> (i32, i32, i32) {
    %c0_i32 = arith.constant 0 : i32
    %c0_i32_0 = arith.constant 0 : i32
    return %arg2, %c0_i32, %arg1 : i32, i32, i32
  }
  func.func @transform_1(%arg0: i32, %arg1: i32, %arg2: i32) -> (i32, i32, i32) {
    %c0_i32 = arith.constant 0 : i32
    %c0_i32_0 = arith.constant 0 : i32
    return %arg0, %c0_i32, %arg1 : i32, i32, i32
  }
  func.func @transform_2(%arg0: i32, %arg1: i32, %arg2: i32) -> (i32, i32) {
    %c0_i32 = arith.constant 0 : i32
    return %arg0, %arg1 : i32, i32
  }
  func.func @transform_3(%arg0: i32, %arg1: i32, %arg2: i32) -> (i32, i32, i32) {
    %c0_i32 = arith.constant 0 : i32
    return %arg2, %arg0, %arg1 : i32, i32, i32
  }
}

</mosaic_0001>

<bundles_post_ra>
// kernel: neighbor_connected_2d.1
= control target key start
LH: loop header
LB: loop body
LE: loop exit
PB: predicated region body
PF: predicated region fallthrough
CT: control target
= control target key end

     0   :  { %v880_v2 = vmov 1966171168   ;;  %v65_v4 = vlaneseq  ;;  %vm82_vm0 = vcmask 1043456   ;;  %s1473_s0 = inlined_call_operand.vmem [shape: f32[2,36,256], index: 0, kind: input, shape index: {}]   ;;  %s1474_s1 = inlined_call_operand.vmem [shape: f32[4,36,256], index: 1, kind: input, shape index: {}]   ;;  %s1475_s2 = inlined_call_operand.vmem [shape: f32[4,256], index: 2, kind: input, shape index: {}]   ;;  %s1476_s3 = inlined_call_operand.vmem [shape: f32[2,4,256], index: 3, kind: output, shape index: {}]  }
   0x1   :  { %v904_v0 = vld [vmem:[%s1473_s0] sm:$0xff]  ;;  %v909_v1 = vld [vmem:[%s1473_s0 + $0x8] sm:$0xff]  ;;  %v63_v3 = vunpack.c.l.s4 %v880_v2  ;;  %v914_v5 = vld [vmem:[%s1473_s0 + $0x10] sm:$0xff] }
   0x2   :  { %v919_v6 = vld [vmem:[%s1473_s0 + $0x18] sm:$0xff]  ;;  %v924_v7 = vld [vmem:[%s1473_s0 + $0x20] sm:$0xff]  ;;  %v929_v8 = vld [vmem:[%s1473_s0 + $0x28] sm:$0xff]  ;;  %v66_v19 = vshrl.u32 %v65_v4, 7  ;;  %vm1109_vm1 = vcmp.lt.s32.totalorder %v65_v4, 256 }
   0x3   :  { %v934_v9 = vld [vmem:[%s1473_s0 + $0x30] sm:$0xff]  ;;  %v939_v10 = vld [vmem:[%s1473_s0 + $0x38] sm:$0xff]  ;;  %v944_v11 = vld [vmem:[%s1473_s0 + $0x40] sm:$0xf]  ;;  %v64_v18 = vunpack.c.0.s8 %v63_v3 }
   0x4   :  { %v949_v12 = vld [vmem:[%s1473_s0 + $0x48] sm:$0xf]  ;;  %v954_v13 = vld [vmem:[%s1474_s1] sm:$0xff]  ;;  %v964_v15 = vld [vmem:[%s1474_s1 + $0x10] sm:$0xff] }
   0x5   :  { %v959_v14 = vld [vmem:[%s1474_s1 + $0x8] sm:$0xff]  ;;  %v969_v16 = vld [vmem:[%s1474_s1 + $0x18] sm:$0xff]  ;;  %v33_v17 = vmul.f32 %v954_v13, %v904_v0  ;;  %v977_v20 = vld [vmem:[%s1474_s1 + $0x20] sm:$0xff]  ;;  %v35_v24 = vmul.f32 %v964_v15, %v914_v5  ;;  %v1025_v38 = vsub.s32 %v64_v18, %v66_v19 }
   0x6   :  { %v982_v21 = vld [vmem:[%s1474_s1 + $0x28] sm:$0xff]  ;;  %v987_v22 = vld [vmem:[%s1474_s1 + $0x30] sm:$0xff]  ;;  %v34_v23 = vmul.f32 %v959_v14, %v909_v1  ;;  %v36_v25 = vmul.f32 %v969_v16, %v919_v6  ;;  %v998_v26 = vld [vmem:[%s1474_s1 + $0x38] sm:$0xff]  ;;  %v37_v27 = vmul.f32 %v977_v20, %v924_v7 }
   0x7   :  { %v38_v28 = vmul.f32 %v982_v21, %v929_v8  ;;  %v39_v29 = vmul.f32 %v987_v22, %v934_v9  ;;  %v78_v30 = vld [vmem:[%s1474_s1 + $0x40] sm:$0xf]  ;;  %v79_v31 = vld [vmem:[%s1474_s1 + $0x48] sm:$0xf]  ;;  %v40_v32 = vmul.f32 %v998_v26, %v939_v10  ;;  %v41_v33 = vadd.f32 %v35_v24, %v33_v17  ;;  %v1018_v36 = vld [vmem:[%s1474_s1 + $0x50] sm:$0xff] }
   0x8   :  { %v50_v34 = vadd.f32 %v36_v25, %v34_v23  ;;  %v80_v35 = vmul.f32 %v78_v30, %v944_v11  ;;  %v1023_v37 = vld [vmem:[%s1474_s1 + $0x58] sm:$0xff]  ;;  %v81_v39 = vmul.f32 %v79_v31, %v949_v12  ;;  %v1031_v40 = vld [vmem:[%s1474_s1 + $0x60] sm:$0xff]  ;;  %v1036_v41 = vld [vmem:[%s1474_s1 + $0x68] sm:$0xff]  ;;  %v132_v43 = vmul.f32 %v1018_v36, %v904_v0 }
   0x9   :  { %v1041_v42 = vld [vmem:[%s1474_s1 + $0x70] sm:$0xff]  ;;  %v133_v44 = vmul.f32 %v1023_v37, %v909_v1  ;;  %v42_v45 = vadd.f32 %v41_v33, %v37_v27  ;;  %v1051_v48 = vld [vmem:[%s1474_s1 + $0x78] sm:$0xff]  ;;  %v1056_v49 = vld [vmem:[%s1474_s1 + $0x80] sm:$0xff]  ;;  %v134_v51 = vmul.f32 %v1031_v40, %v914_v5  ;;  %v135_v54 = vmul.f32 %v1036_v41, %v919_v6 }
   0xa   :  { %v51_v46 = vadd.f32 %v50_v34, %v38_v28  ;;  %v83_v47 = vsel %vm82_vm0, %v80_v35, 0.0  ;;  %v1061_v50 = vld [vmem:[%s1474_s1 + $0x88] sm:$0xff]  ;;  %v90_v53 = vsel %vm82_vm0, %v81_v39, 0.0  ;;  %v136_v55 = vmul.f32 %v1041_v42, %v924_v7  ;;  %v805_v60 = vld [vmem:[%s1474_s1 + $0x90] sm:$0xf] }
   0xb   :  { %v84_v52 = vrot.slane %v83_v47, 4  ;;  %v43_v56 = vadd.f32 %v42_v45, %v39_v29  ;;  %v91_v58 = vrot.slane %v90_v53, 4  ;;  %v137_v59 = vmul.f32 %v1051_v48, %v929_v8  ;;  %v806_v61 = vld [vmem:[%s1474_s1 + $0x98] sm:$0xf]  ;;  %v1124_v4 = vld [vmem:[%s1474_s1 + $0xc8] sm:$0xff] }
   0xc   :  { %v52_v57 = vadd.f32 %v51_v46, %v40_v32  ;;  %v138_v63 = vmul.f32 %v1056_v49, %v934_v9  ;;  %v139_v2 = vmul.f32 %v1061_v50, %v939_v10  ;;  %v140_v3 = vadd.f32 %v134_v51, %v132_v43  ;;  %1485 = vst [vmem:[#allocation2_spill] sm:$0xff] %v1124_v4 }
   0xd   :  { %v85_v62 = vadd.f32 %v84_v52, %v83_v47  ;;  %v44_v17 = vrot.slane %v43_v56, 4  ;;  %v92_v19 = vadd.f32 %v91_v58, %v90_v53  ;;  %v149_v23 = vadd.f32 %v135_v54, %v133_v44  ;;  %v1089_v58 = vld [vmem:[%s1474_s1 + $0xa0] sm:$0xff] }
   0xe   :  { %v53_v18 = vrot.slane %v52_v57, 4  ;;  %v141_v25 = vadd.f32 %v140_v3, %v136_v55  ;;  %v179_v27 = vmul.f32 %v805_v60, %v944_v11  ;;  %v180_v28 = vmul.f32 %v806_v61, %v949_v12 }
   0xf   :  { %v86_v24 = vrot.slane %v85_v62, 2  ;;  %v45_v29 = vadd.f32 %v44_v17, %v43_v56  ;;  %v93_v31 = vrot.slane %v92_v19, 2  ;;  %v150_v32 = vadd.f32 %v149_v23, %v137_v59 }
  0x10   :  { %v54_v30 = vadd.f32 %v53_v18, %v52_v57  ;;  %v142_v34 = vadd.f32 %v141_v25, %v138_v63  ;;  %v181_v35 = vsel %vm82_vm0, %v179_v27, 0.0  ;;  %v188_v39 = vsel %vm82_vm0, %v180_v28, 0.0  ;;  %v1094_v18 = vld [vmem:[%s1474_s1 + $0xa8] sm:$0xff]  ;;  %v1099_v25 = vld [vmem:[%s1474_s1 + $0xb0] sm:$0xff] }
  0x11   :  { %v87_v33 = vadd.f32 %v86_v24, %v85_v62  ;;  %v46_v43 = vrot.slane %v45_v29, 2  ;;  %v94_v46 = vadd.f32 %v93_v31, %v92_v19  ;;  %v151_v44 = vadd.f32 %v150_v32, %v139_v2  ;;  %v1106_v32 = vld [vmem:[%s1474_s1 + $0xb8] sm:$0xff] }
  0x12   :  { %v55_v45 = vrot.slane %v54_v30, 2  ;;  %v143_v51 = vrot.slane %v142_v34, 4  ;;  %v182_v52 = vrot.slane %v181_v35, 4  ;;  %v189_v53 = vrot.slane %v188_v39, 4 }
  0x13   :  { %v88_v47 = vrot.slane %v87_v33, 1  ;;  %v47_v54 = vadd.f32 %v46_v43, %v45_v29  ;;  %v95_v56 = vrot.slane %v94_v46, 1  ;;  %v152_v57 = vrot.slane %v151_v44, 4  ;;  %v1116_v43 = vld [vmem:[%s1474_s1 + $0xc0] sm:$0xff] }
  0x14   :  { %v56_v55 = vadd.f32 %v55_v45, %v54_v30  ;;  %v144_v60 = vadd.f32 %v143_v51, %v142_v34  ;;  %v183_v61 = vadd.f32 %v182_v52, %v181_v35  ;;  %v190_v62 = vadd.f32 %v189_v53, %v188_v39 }
  0x15   :  { %v89_v59 = vadd.f32 %v88_v47, %v87_v33  ;;  %v48_v63 = vrot.slane %v47_v54, 1  ;;  %v96_v2 = vadd.f32 %v95_v56, %v94_v46  ;;  %v153_v17 = vadd.f32 %v152_v57, %v151_v44  ;;  %v1136_v56 = vld [vmem:[%s1474_s1 + $0xd8] sm:$0xff] }
  0x16   :  { %v57_v3 = vrot.slane %v56_v55, 1  ;;  %v145_v19 = vrot.slane %v144_v60, 2  ;;  %v184_v23 = vrot.slane %v183_v61, 2  ;;  %v191_v24 = vrot.slane %v190_v62, 2 }
  0x17   :  { %v227_v27 = vmul.f32 %v1089_v58, %v904_v0  ;;  %v49_v28 = vadd.f32 %v48_v63, %v47_v54  ;;  %v99_v30 = vcombine.low %v89_v59, %v96_v2  ;;  %v154_v31 = vrot.slane %v153_v17, 2  ;;  %v817_v63 = vld [vmem:[%s1474_s1 + $0xe0] sm:$0xf] }
  0x18   :  { %v58_v29 = vadd.f32 %v57_v3, %v56_v55  ;;  %v146_v34 = vadd.f32 %v145_v19, %v144_v60  ;;  %v185_v35 = vadd.f32 %v184_v23, %v183_v61  ;;  %v192_v39 = vadd.f32 %v191_v24, %v190_v62  ;;  %v1131_v55 = vld [vmem:[%s1474_s1 + $0xd0] sm:$0xff]  ;;  %v24_v3 = vld [vmem:[%s1475_s2] ss:$4 sm:$0x3]  ;;  %v818_v24 = vld [vmem:[%s1474_s1 + $0xe8] sm:$0xf] }
  0x19   :  { %v228_v45 = vmul.f32 %v1094_v18, %v909_v1  ;;  %v106_v44 = vrot.slane %v99_v30, %v1025_v38  ;;  %v155_v47 = vadd.f32 %v154_v31, %v153_v17  ;;  %v229_v51 = vmul.f32 %v1099_v25, %v914_v5  ;;  %1486 = vst [vmem:[#allocation3_spill] sm:$0xff] %v1131_v55 }
  0x1a   :  { %v61_v46 = vcombine.low %v49_v28, %v58_v29  ;;  %v147_v52 = vrot.slane %v146_v34, 1  ;;  %v186_v53 = vrot.slane %v185_v35, 1  ;;  %v193_v54 = vrot.slane %v192_v39, 1  ;;  %v1158_v28 = vld [vmem:[%s1474_s1 + $0xf0] sm:$0xff] }
  0x1b   :  { %v230_v57 = vmul.f32 %v1106_v32, %v919_v6  ;;  %v113_v60 = vrot.slane %v106_v44, %v1025_v38  ;;  %v156_v61 = vrot.slane %v155_v47, 1  ;;  %v231_v62 = vmul.f32 %v1116_v43, %v924_v7 }
  0x1c   :  { %v68_v59 = vrot.slane %v61_v46, %v1025_v38  ;;  %v148_v2 = vadd.f32 %v147_v52, %v146_v34  ;;  %v187_v17 = vadd.f32 %v186_v53, %v185_v35  ;;  %v194_v19 = vadd.f32 %v193_v54, %v192_v39 }
  0x1d   :  { %v232_v23 = vmul.f32 %v1124_v4, %v929_v8  ;;  %v157_v30 = vadd.f32 %v156_v61, %v155_v47  ;;  %v233_v31 = vmul.f32 %v1131_v55, %v934_v9  ;;  %v234_v34 = vmul.f32 %v1136_v56, %v939_v10 }
  0x1e   :  { %v75_v29 = vrot.slane %v68_v59, %v1025_v38  ;;  %v197_v35 = vcombine.low %v187_v17, %v194_v19  ;;  %v235_v39 = vadd.f32 %v229_v51, %v227_v27  ;;  %v244_v46 = vadd.f32 %v230_v57, %v228_v45  ;;  %v1174_v27 = vld [vmem:[%s1474_s1 + $0xf8] sm:$0xff]  ;;  %v1179_v45 = vld [vmem:[%s1474_s1 + $0x100] sm:$0xff] }
  0x1f   :  { %v274_v44 = vmul.f32 %v817_v63, %v944_v11  ;;  %v160_v53 = vcombine.low %v148_v2, %v157_v30  ;;  %v275_v54 = vmul.f32 %v818_v24, %v949_v12  ;;  %v322_v4 = vmul.f32 %v1158_v28, %v904_v0  ;;  %v1200_v24 = vld [vmem:[%s1474_s1 + $0x118] sm:$0xff] }
  0x20   :  { %v77_v52 = vadd.f32 %v75_v29, %v24_v3  ;;  %v204_v47 = vrot.slane %v197_v35, %v1025_v38  ;;  %v236_v59 = vadd.f32 %v235_v39, %v231_v62  ;;  %v245_v61 = vadd.f32 %v244_v46, %v232_v23  ;;  %v1186_v62 = vld [vmem:[%s1474_s1 + $0x108] sm:$0xff]  ;;  %v796_v3 = vld [vmem:[%s1475_s2 + $0x1] ss:$4 sm:$0x3]  ;;  %1488 = vst [vmem:[#allocation5_spill] sm:$0xff] %v1200_v24 }
  0x21   :  { %v276_v55 = vsel %vm82_vm0, %v274_v44, 0.0  ;;  %v167_v57 = vrot.slane %v160_v53, %v1025_v38  ;;  %v283_v63 = vsel %vm82_vm0, %v275_v54, 0.0  ;;  %v324_v35 = vmul.f32 %v1179_v45, %v914_v5 }
  0x22   :  { %v115_v51 = vadd.f32 %v113_v60, %v77_v52  ;;  %v277_v0 = vrot.slane %v276_v55, 4  ;;  %v211_v2 = vrot.slane %v204_v47, %v1025_v38  ;;  %v237_v17 = vadd.f32 %v236_v59, %v233_v31  ;;  %v1195_v60 = vld [vmem:[%s1474_s1 + $0x110] sm:$0xff]  ;;  %v1211_v31 = vld [vmem:[%s1474_s1 + $0x120] sm:$0xff]  ;;  %v1220_v52 = vld [vmem:[%s1474_s1 + $0x128] sm:$0xff] }
  0x23   :  { %v246_v19 = vadd.f32 %v245_v61, %v234_v34  ;;  %v284_v23 = vrot.slane %v283_v63, 4  ;;  %1487 = vst [vmem:[#allocation4_spill] sm:$0xff] %v1195_v60  ;;  %v174_v29 = vrot.slane %v167_v57, %v1025_v38  ;;  %1489 = vst [vmem:[#allocation6_spill] sm:$0xff] %v1211_v31  ;;  %v323_v34 = vmul.f32 %v1174_v27, %v909_v1  ;;  %v829_v57 = vld [vmem:[%s1474_s1 + $0x130] sm:$0xf] }
  0x24   :  { %120 = vst.msk [vmem:[%s1476_s3] ss:$4 sm:$0x3] %vm1109_vm1, %v115_v51  ;;  %v278_v30 = vadd.f32 %v277_v0, %v276_v55  ;;  %v238_v39 = vrot.slane %v237_v17, 4  ;;  %1490 = vst [vmem:[#allocation7_spill] sm:$0xff] %v1220_v52  ;;  %v325_v55 = vmul.f32 %v1186_v62, %v919_v6  ;;  %v326_v47 = vmul.f32 %v1195_v60, %v924_v7 }
  0x25   :  { %v247_v46 = vrot.slane %v246_v19, 4  ;;  %v285_v44 = vadd.f32 %v284_v23, %v283_v63  ;;  %v176_v53 = vadd.f32 %v796_v3, %v174_v29  ;;  %v327_v1 = vmul.f32 %v1200_v24, %v929_v8  ;;  %v830_v6 = vld [vmem:[%s1474_s1 + $0x138] sm:$0xf] }
  0x26   :  { %v279_v54 = vrot.slane %v278_v30, 2  ;;  %v239_v5 = vadd.f32 %v238_v39, %v237_v17  ;;  %v328_v51 = vmul.f32 %v1211_v31, %v934_v9  ;;  %v329_v7 = vmul.f32 %v1220_v52, %v939_v10 }
  0x27   :  { %v248_v59 = vadd.f32 %v247_v46, %v246_v19  ;;  %v286_v61 = vrot.slane %v285_v44, 2  ;;  %v213_v0 = vadd.f32 %v211_v2, %v176_v53  ;;  %v330_v8 = vadd.f32 %v324_v35, %v322_v4 }
  0x28   :  { %v280_v63 = vadd.f32 %v279_v54, %v278_v30  ;;  %v240_v3 = vrot.slane %v239_v5, 2  ;;  %v339_v23 = vadd.f32 %v325_v55, %v323_v34  ;;  %v369_v39 = vmul.f32 %v829_v57, %v944_v11  ;;  %v1248_v34 = vld [vmem:[%s1473_s0 + $0x50] sm:$0xff] }
  0x29   :  { %v249_v17 = vrot.slane %v248_v59, 2  ;;  %v287_v19 = vadd.f32 %v286_v61, %v285_v44  ;;  %807 = vst.msk [vmem:[%s1476_s3 + $0x1] ss:$4 sm:$0x3] %vm1109_vm1, %v213_v0  ;;  %v331_v29 = vadd.f32 %v330_v8, %v326_v47  ;;  %v370_v2 = vmul.f32 %v830_v6, %v949_v12  ;;  %v1255_v12 = vld [vmem:[%s1473_s0 + $0x58] sm:$0xff]  ;;  %v1267_v8 = vld [vmem:[%s1473_s0 + $0x68] sm:$0xff] }
  0x2a   :  { %v281_v9 = vrot.slane %v280_v63, 1  ;;  %v241_v30 = vadd.f32 %v240_v3, %v239_v5  ;;  %v340_v4 = vadd.f32 %v339_v23, %v327_v1  ;;  %v371_v55 = vsel %vm82_vm0, %v369_v39, 0.0  ;;  %v1272_v23 = vld [vmem:[%s1473_s0 + $0x70] sm:$0xff] }
  0x2b   :  { %v250_v46 = vadd.f32 %v249_v17, %v248_v59  ;;  %v288_v10 = vrot.slane %v287_v19, 1  ;;  %v332_v44 = vadd.f32 %v331_v29, %v328_v51  ;;  %v378_v53 = vsel %vm82_vm0, %v370_v2, 0.0  ;;  %v1260_v51 = vld [vmem:[%s1473_s0 + $0x60] sm:$0xff]  ;;  %v1280_v2 = vld [vmem:[%s1473_s0 + $0x78] sm:$0xff] }
  0x2c   :  { %v282_v35 = vadd.f32 %v281_v9, %v280_v63  ;;  %v242_v54 = vrot.slane %v241_v30, 1  ;;  %v341_v61 = vadd.f32 %v340_v4, %v329_v7  ;;  %v372_v5 = vrot.slane %v371_v55, 4 }
  0x2d   :  { %v251_v47 = vrot.slane %v250_v46, 1  ;;  %v289_v11 = vadd.f32 %v288_v10, %v287_v19  ;;  %v333_v1 = vrot.slane %v332_v44, 4  ;;  %v379_v59 = vrot.slane %v378_v53, 4 }
  0x2e   :  { %v426_v57 = vmul.f32 %v1248_v34, %v954_v13  ;;  %v243_v6 = vadd.f32 %v242_v54, %v241_v30  ;;  %v342_v7 = vrot.slane %v341_v61, 4  ;;  %v373_v17 = vadd.f32 %v372_v5, %v371_v55  ;;  %v1306_v5 = vld [vmem:[%s1473_s0 + $0x90] sm:$0xf] }
  0x2f   :  { %v252_v0 = vadd.f32 %v251_v47, %v250_v46  ;;  %v292_v63 = vcombine.low %v282_v35, %v289_v11  ;;  %v334_v3 = vadd.f32 %v333_v1, %v332_v44  ;;  %v380_v19 = vadd.f32 %v379_v59, %v378_v53  ;;  %v1287_v35 = vld [vmem:[%s1473_s0 + $0x80] sm:$0xff] }
  0x30   :  { %v427_v13 = vmul.f32 %v1255_v12, %v959_v14  ;;  %v343_v39 = vadd.f32 %v342_v7, %v341_v61  ;;  %v428_v30 = vmul.f32 %v1260_v51, %v964_v15  ;;  %v374_v10 = vrot.slane %v373_v17, 2  ;;  %v1292_v14 = vld [vmem:[%s1473_s0 + $0x88] sm:$0xff]  ;;  %v808_v15 = vld [vmem:[%s1475_s2 + $0x2] ss:$4 sm:$0x3] }
  0x31   :  { %v255_v9 = vcombine.low %v243_v6, %v252_v0  ;;  %v299_v29 = vrot.slane %v292_v63, %v1025_v38  ;;  %v335_v46 = vrot.slane %v334_v3, 2  ;;  %v381_v4 = vrot.slane %v380_v19, 2  ;;  %v471_v59 = vld [vmem:[%s1474_s1 + $0x40] sm:$0xf] }
  0x32   :  { %v429_v44 = vmul.f32 %v1267_v8, %v969_v16  ;;  %v344_v54 = vrot.slane %v343_v39, 2  ;;  %v430_v47 = vmul.f32 %v1272_v23, %v977_v20  ;;  %v375_v61 = vadd.f32 %v374_v10, %v373_v17  ;;  %v1317_v20 = vld [vmem:[%s1473_s0 + $0x98] sm:$0xf] }
  0x33   :  { %v262_v55 = vrot.slane %v255_v9, %v1025_v38  ;;  %v306_v53 = vrot.slane %v299_v29, %v1025_v38  ;;  %v336_v11 = vadd.f32 %v335_v46, %v334_v3  ;;  %v382_v1 = vadd.f32 %v381_v4, %v380_v19  ;;  %v472_v9 = vld [vmem:[%s1474_s1 + $0x48] sm:$0xf] }
  0x34   :  { %v431_v16 = vmul.f32 %v1280_v2, %v982_v21  ;;  %v345_v0 = vadd.f32 %v344_v54, %v343_v39  ;;  %v432_v63 = vmul.f32 %v1287_v35, %v987_v22  ;;  %v433_v7 = vmul.f32 %v1292_v14, %v998_v26 }
  0x35   :  { %v269_v6 = vrot.slane %v262_v55, %v1025_v38  ;;  %v337_v3 = vrot.slane %v336_v11, 1  ;;  %v376_v21 = vrot.slane %v375_v61, 1  ;;  %v383_v17 = vrot.slane %v382_v1, 1 }
  0x36   :  { %v434_v19 = vadd.f32 %v428_v30, %v426_v57  ;;  %v346_v39 = vrot.slane %v345_v0, 1  ;;  %v443_v46 = vadd.f32 %v429_v44, %v427_v13  ;;  %v473_v10 = vmul.f32 %v1306_v5, %v471_v59 }
  0x37   :  { %v271_v29 = vadd.f32 %v808_v15, %v269_v6  ;;  %v338_v4 = vadd.f32 %v337_v3, %v336_v11  ;;  %v377_v55 = vadd.f32 %v376_v21, %v375_v61  ;;  %v384_v54 = vadd.f32 %v383_v17, %v382_v1 }
  0x38   :  { %v435_v22 = vadd.f32 %v434_v19, %v430_v47  ;;  %v347_v31 = vadd.f32 %v346_v39, %v345_v0  ;;  %v444_v26 = vadd.f32 %v443_v46, %v431_v16  ;;  %v474_v24 = vmul.f32 %v1317_v20, %v472_v9 }
  0x39   :  { %v308_v52 = vadd.f32 %v306_v53, %v271_v29  ;;  %v387_v60 = vcombine.low %v377_v55, %v384_v54  ;;  %v475_v30 = vsel %vm82_vm0, %v473_v10, 0.0  ;;  %v519_v15 = vmul.f32 %v1248_v34, %v1018_v36  ;;  %v852_v29 = vld [vmem:[%s1474_s1 + $0x90] sm:$0xf] }
  0x3a   :  { %v436_v57 = vadd.f32 %v435_v22, %v432_v63  ;;  %v350_v13 = vcombine.low %v338_v4, %v347_v31  ;;  %v445_v44 = vadd.f32 %v444_v26, %v433_v7  ;;  %v476_v53 = vrot.slane %v475_v30, 4  ;;  %v820_v31 = vld [vmem:[%s1475_s2 + $0x3] ss:$4 sm:$0x3] }
  0x3b   :  { %819 = vst.msk [vmem:[%s1476_s3 + $0x2] ss:$4 sm:$0x3] %vm1109_vm1, %v308_v52  ;;  %v482_v47 = vsel %vm82_vm0, %v474_v24, 0.0  ;;  %v394_v11 = vrot.slane %v387_v60, %v1025_v38  ;;  %v520_v16 = vmul.f32 %v1255_v12, %v1023_v37  ;;  %v521_v0 = vmul.f32 %v1260_v51, %v1031_v40 }
  0x3c   :  { %v437_v61 = vrot.slane %v436_v57, 4  ;;  %v483_v1 = vrot.slane %v482_v47, 4  ;;  %v357_v36 = vrot.slane %v350_v13, %v1025_v38  ;;  %v446_v59 = vrot.slane %v445_v44, 4 }
  0x3d   :  { %v477_v6 = vadd.f32 %v476_v53, %v475_v30  ;;  %v401_v24 = vrot.slane %v394_v11, %v1025_v38  ;;  %v522_v63 = vmul.f32 %v1267_v8, %v1036_v41  ;;  %v523_v21 = vmul.f32 %v1272_v23, %v1041_v42 }
  0x3e   :  { %v438_v52 = vadd.f32 %v437_v61, %v436_v57  ;;  %v484_v60 = vadd.f32 %v483_v1, %v482_v47  ;;  %v364_v37 = vrot.slane %v357_v36, %v1025_v38  ;;  %v447_v7 = vadd.f32 %v446_v59, %v445_v44 }
  0x3f   :  { %v478_v3 = vrot.slane %v477_v6, 2  ;;  %v524_v19 = vmul.f32 %v1280_v2, %v1051_v48  ;;  %v525_v9 = vmul.f32 %v1287_v35, %v1056_v49  ;;  %v526_v10 = vmul.f32 %v1292_v14, %v1061_v50  ;;  %v853_v48 = vld [vmem:[%s1474_s1 + $0x98] sm:$0xf] }
  0x40   :  { %v439_v17 = vrot.slane %v438_v52, 2  ;;  %v485_v40 = vrot.slane %v484_v60, 2  ;;  %v366_v41 = vadd.f32 %v820_v31, %v364_v37  ;;  %v448_v39 = vrot.slane %v447_v7, 2 }
  0x41   :  { %v479_v46 = vadd.f32 %v478_v3, %v477_v6  ;;  %v527_v55 = vadd.f32 %v521_v0, %v519_v15  ;;  %v536_v54 = vadd.f32 %v522_v63, %v520_v16  ;;  %v566_v57 = vmul.f32 %v852_v29, %v1306_v5 }
  0x42   :  { %v440_v4 = vadd.f32 %v439_v17, %v438_v52  ;;  %v486_v42 = vadd.f32 %v485_v40, %v484_v60  ;;  %v403_v22 = vadd.f32 %v401_v24, %v366_v41  ;;  %v449_v49 = vadd.f32 %v448_v39, %v447_v7 }
  0x43   :  { %v480_v26 = vrot.slane %v479_v46, 1  ;;  %v528_v44 = vadd.f32 %v527_v55, %v523_v21  ;;  %v537_v53 = vadd.f32 %v536_v54, %v524_v19  ;;  %v567_v47 = vmul.f32 %v853_v48, %v1317_v20  ;;  %v1491_v54 = vld [vmem:[#allocation2_spill] sm:$0xff] }
  0x44   :  { %v441_v30 = vrot.slane %v440_v4, 1  ;;  %v487_v13 = vrot.slane %v486_v42, 1  ;;  %831 = vst.msk [vmem:[%s1476_s3 + $0x3] ss:$4 sm:$0x3] %vm1109_vm1, %v403_v22  ;;  %v450_v50 = vrot.slane %v449_v49, 1  ;;  %v612_v31 = vmul.f32 %v1248_v34, %v1089_v58 }
  0x45   :  { %v481_v15 = vadd.f32 %v480_v26, %v479_v46  ;;  %v568_v11 = vsel %vm82_vm0, %v566_v57, 0.0  ;;  %v529_v16 = vadd.f32 %v528_v44, %v525_v9  ;;  %v538_v36 = vadd.f32 %v537_v53, %v526_v10  ;;  %v1492_v22 = vld [vmem:[#allocation3_spill] sm:$0xff] }
  0x46   :  { %v442_v61 = vadd.f32 %v441_v30, %v440_v4  ;;  %v488_v1 = vadd.f32 %v487_v13, %v486_v42  ;;  %v451_v59 = vadd.f32 %v450_v50, %v449_v49  ;;  %v569_v6 = vrot.slane %v568_v11, 4 }
  0x47   :  { %v575_v0 = vsel %vm82_vm0, %v567_v47, 0.0  ;;  %v530_v52 = vrot.slane %v529_v16, 4  ;;  %v539_v60 = vrot.slane %v538_v36, 4  ;;  %v613_v3 = vmul.f32 %v1255_v12, %v1094_v18  ;;  %v417_v18 = vld [vmem:[%s1475_s2] ss:$4 sm:$0x3] }
  0x48   :  { %v491_v24 = vcombine.low %v481_v15, %v488_v1  ;;  %v576_v63 = vrot.slane %v575_v0, 4  ;;  %v454_v37 = vcombine.low %v442_v61, %v451_v59  ;;  %v570_v7 = vadd.f32 %v569_v6, %v568_v11  ;;  %v865_v15 = vld [vmem:[%s1474_s1 + $0xe8] sm:$0xf] }
  0x49   :  { %v614_v21 = vmul.f32 %v1260_v51, %v1099_v25  ;;  %v531_v40 = vadd.f32 %v530_v52, %v529_v16  ;;  %v540_v19 = vadd.f32 %v539_v60, %v538_v36  ;;  %v615_v41 = vmul.f32 %v1267_v8, %v1106_v32 }
  0x4a   :  { %v498_v17 = vrot.slane %v491_v24, %v1025_v38  ;;  %v577_v9 = vadd.f32 %v576_v63, %v575_v0  ;;  %v461_v29 = vrot.slane %v454_v37, %v1025_v38  ;;  %v571_v58 = vrot.slane %v570_v7, 2 }
  0x4b   :  { %v616_v39 = vmul.f32 %v1272_v23, %v1116_v43  ;;  %v532_v46 = vrot.slane %v531_v40, 2  ;;  %v541_v10 = vrot.slane %v540_v19, 2  ;;  %v617_v48 = vmul.f32 %v1280_v2, %v1491_v54  ;;  %v864_v43 = vld [vmem:[%s1474_s1 + $0xe0] sm:$0xf] }
  0x4c   :  { %v505_v25 = vrot.slane %v498_v17, %v1025_v38  ;;  %v578_v4 = vrot.slane %v577_v9, 2  ;;  %v468_v42 = vrot.slane %v461_v29, %v1025_v38  ;;  %v572_v55 = vadd.f32 %v571_v58, %v570_v7 }
  0x4d   :  { %v618_v32 = vmul.f32 %v1287_v35, %v1492_v22  ;;  %v533_v49 = vadd.f32 %v532_v46, %v531_v40  ;;  %v542_v26 = vadd.f32 %v541_v10, %v540_v19  ;;  %v619_v30 = vmul.f32 %v1292_v14, %v1136_v56 }
  0x4e   :  { %v579_v57 = vadd.f32 %v578_v4, %v577_v9  ;;  %v470_v13 = vadd.f32 %v468_v42, %v417_v18  ;;  %v573_v44 = vrot.slane %v572_v55, 1  ;;  %v620_v53 = vadd.f32 %v614_v21, %v612_v31  ;;  %v1493_v42 = vld [vmem:[#allocation4_spill] sm:$0xff] }
  0x4f   :  { %v629_v50 = vadd.f32 %v615_v41, %v613_v3  ;;  %v534_v47 = vrot.slane %v533_v49, 1  ;;  %v543_v11 = vrot.slane %v542_v26, 1  ;;  %v659_v1 = vmul.f32 %v864_v43, %v1306_v5 }
  0x50   :  { %v580_v61 = vrot.slane %v579_v57, 1  ;;  %v507_v16 = vadd.f32 %v505_v25, %v470_v13  ;;  %v574_v36 = vadd.f32 %v573_v44, %v572_v55  ;;  %v621_v59 = vadd.f32 %v620_v53, %v616_v39 }
  0x51   :  { %v630_v6 = vadd.f32 %v629_v50, %v617_v48  ;;  %v535_v0 = vadd.f32 %v534_v47, %v533_v49  ;;  %v544_v24 = vadd.f32 %v543_v11, %v542_v26  ;;  %v660_v52 = vmul.f32 %v865_v15, %v1317_v20  ;;  %v1494_v48 = vld [vmem:[#allocation5_spill] sm:$0xff]  ;;  %v1496_v26 = vld [vmem:[#allocation7_spill] sm:$0xff] }
  0x52   :  { %v581_v56 = vadd.f32 %v580_v61, %v579_v57  ;;  %842 = vst.msk [vmem:[%s1476_s3 + $0x8] ss:$4 sm:$0x3] %vm1109_vm1, %v507_v16  ;;  %v622_v31 = vadd.f32 %v621_v59, %v618_v32  ;;  %v661_v63 = vsel %vm82_vm0, %v659_v1, 0.0  ;;  %v705_v37 = vmul.f32 %v1248_v34, %v1158_v28  ;;  %v876_v32 = vld [vmem:[%s1474_s1 + $0x130] sm:$0xf] }
  0x53   :  { %v631_v60 = vadd.f32 %v630_v6, %v619_v30  ;;  %v547_v7 = vcombine.low %v535_v0, %v544_v24  ;;  %v662_v21 = vrot.slane %v661_v63, 4  ;;  %v668_v17 = vsel %vm82_vm0, %v660_v52, 0.0  ;;  %v843_v28 = vld [vmem:[%s1475_s2 + $0x1] ss:$4 sm:$0x3] }
  0x54   :  { %v584_v3 = vcombine.low %v574_v36, %v581_v56  ;;  %v623_v40 = vrot.slane %v622_v31, 4  ;;  %v669_v9 = vrot.slane %v668_v17, 4  ;;  %v706_v29 = vmul.f32 %v1255_v12, %v1174_v27 }
  0x55   :  { %v632_v19 = vrot.slane %v631_v60, 4  ;;  %v554_v58 = vrot.slane %v547_v7, %v1025_v38  ;;  %v663_v39 = vadd.f32 %v662_v21, %v661_v63  ;;  %v707_v18 = vmul.f32 %v1260_v51, %v1179_v45 }
  0x56   :  { %v591_v41 = vrot.slane %v584_v3, %v1025_v38  ;;  %v624_v34 = vadd.f32 %v623_v40, %v622_v31  ;;  %v670_v46 = vadd.f32 %v669_v9, %v668_v17  ;;  %v708_v10 = vmul.f32 %v1267_v8, %v1186_v62  ;;  %v1495_v8 = vld [vmem:[#allocation6_spill] sm:$0xff] }
  0x57   :  { %v633_v25 = vadd.f32 %v632_v19, %v631_v60  ;;  %v561_v27 = vrot.slane %v554_v58, %v1025_v38  ;;  %v664_v4 = vrot.slane %v663_v39, 2  ;;  %v709_v55 = vmul.f32 %v1272_v23, %v1493_v42  ;;  %v855_v9 = vld [vmem:[%s1475_s2 + $0x2] ss:$4 sm:$0x3] }
  0x58   :  { %v598_v12 = vrot.slane %v591_v41, %v1025_v38  ;;  %v625_v54 = vrot.slane %v624_v34, 2  ;;  %v671_v51 = vrot.slane %v670_v46, 2  ;;  %v710_v22 = vmul.f32 %v1280_v2, %v1494_v48  ;;  %v877_v2 = vld [vmem:[%s1474_s1 + $0x138] sm:$0xf] }
  0x59   :  { %v634_v45 = vrot.slane %v633_v25, 2  ;;  %v563_v43 = vadd.f32 %v843_v28, %v561_v27  ;;  %v665_v62 = vadd.f32 %v664_v4, %v663_v39  ;;  %v711_v49 = vmul.f32 %v1287_v35, %v1495_v8 }
  0x5a   :  { %v712_v57 = vmul.f32 %v1292_v14, %v1496_v26  ;;  %v626_v30 = vadd.f32 %v625_v54, %v624_v34  ;;  %v672_v13 = vadd.f32 %v671_v51, %v670_v46  ;;  %v713_v44 = vadd.f32 %v707_v18, %v705_v37  ;;  %v867_v26 = vld [vmem:[%s1475_s2 + $0x3] ss:$4 sm:$0x3] }
  0x5b   :  { %v635_v23 = vadd.f32 %v634_v45, %v633_v25  ;;  %v600_v53 = vadd.f32 %v598_v12, %v563_v43  ;;  %v666_v50 = vrot.slane %v665_v62, 1  ;;  %v722_v15 = vadd.f32 %v708_v10, %v706_v29 }
  0x5c   :  { %v752_v47 = vmul.f32 %v876_v32, %v1306_v5  ;;  %v627_v11 = vrot.slane %v626_v30, 1  ;;  %v673_v1 = vrot.slane %v672_v13, 1  ;;  %v714_v35 = vadd.f32 %v713_v44, %v709_v55 }
  0x5d   :  { %v636_v61 = vrot.slane %v635_v23, 1  ;;  %854 = vst.msk [vmem:[%s1476_s3 + $0x9] ss:$4 sm:$0x3] %vm1109_vm1, %v600_v53  ;;  %v667_v14 = vadd.f32 %v666_v50, %v665_v62  ;;  %v723_v16 = vadd.f32 %v722_v15, %v710_v22  ;;  %v753_v36 = vmul.f32 %v877_v2, %v1317_v20 }
  0x5e   :  { %v754_v59 = vsel %vm82_vm0, %v752_v47, 0.0  ;;  %v628_v6 = vadd.f32 %v627_v11, %v626_v30  ;;  %v674_v24 = vadd.f32 %v673_v1, %v672_v13  ;;  %v715_v5 = vadd.f32 %v714_v35, %v711_v49 }
  0x5f   :  { %v637_v0 = vadd.f32 %v636_v61, %v635_v23  ;;  %v724_v56 = vadd.f32 %v723_v16, %v712_v57  ;;  %v755_v52 = vrot.slane %v754_v59, 4  ;;  %v761_v31 = vsel %vm82_vm0, %v753_v36, 0.0 }
  0x60   :  { %v677_v63 = vcombine.low %v667_v14, %v674_v24  ;;  %v716_v37 = vrot.slane %v715_v5, 4  ;;  %v762_v7 = vrot.slane %v761_v31, 4 }
  0x61   :  { %v640_v60 = vcombine.low %v628_v6, %v637_v0  ;;  %v725_v3 = vrot.slane %v724_v56, 4  ;;  %v756_v21 = vadd.f32 %v755_v52, %v754_v59 }
  0x62   :  { %v684_v20 = vrot.slane %v677_v63, %v1025_v38  ;;  %v717_v40 = vadd.f32 %v716_v37, %v715_v5  ;;  %v763_v19 = vadd.f32 %v762_v7, %v761_v31 }
  0x63   :  { %v647_v17 = vrot.slane %v640_v60, %v1025_v38  ;;  %v726_v29 = vadd.f32 %v725_v3, %v724_v56  ;;  %v757_v58 = vrot.slane %v756_v21, 2 }
  0x64   :  { %v691_v39 = vrot.slane %v684_v20, %v1025_v38  ;;  %v718_v18 = vrot.slane %v717_v40, 2  ;;  %v764_v28 = vrot.slane %v763_v19, 2 }
  0x65   :  { %v654_v41 = vrot.slane %v647_v17, %v1025_v38  ;;  %v727_v34 = vrot.slane %v726_v29, 2  ;;  %v758_v25 = vadd.f32 %v757_v58, %v756_v21 }
  0x66   :  { %v719_v10 = vadd.f32 %v718_v18, %v717_v40  ;;  %v765_v27 = vadd.f32 %v764_v28, %v763_v19 }
  0x67   :  { %v656_v46 = vadd.f32 %v855_v9, %v654_v41  ;;  %v728_v12 = vadd.f32 %v727_v34, %v726_v29  ;;  %v759_v4 = vrot.slane %v758_v25, 1 }
  0x68   :  { %v720_v55 = vrot.slane %v719_v10, 1  ;;  %v766_v54 = vrot.slane %v765_v27, 1 }
  0x69   :  { %v693_v42 = vadd.f32 %v691_v39, %v656_v46  ;;  %v729_v45 = vrot.slane %v728_v12, 1  ;;  %v760_v51 = vadd.f32 %v759_v4, %v758_v25 }
  0x6a   :  { %v721_v48 = vadd.f32 %v720_v55, %v719_v10  ;;  %v767_v22 = vadd.f32 %v766_v54, %v765_v27 }
  0x6b   :  { %866 = vst.msk [vmem:[%s1476_s3 + $0xa] ss:$4 sm:$0x3] %vm1109_vm1, %v693_v42  ;;  %v730_v32 = vadd.f32 %v729_v45, %v728_v12 }
  0x6c   :  { %v770_v43 = vcombine.low %v760_v51, %v767_v22 }
  0x6d   :  { %v733_v62 = vcombine.low %v721_v48, %v730_v32 }
  0x6e   :  { %v777_v8 = vrot.slane %v770_v43, %v1025_v38 }
  0x6f   :  { %v740_v49 = vrot.slane %v733_v62, %v1025_v38 }
  0x70   :  { %v784_v30 = vrot.slane %v777_v8, %v1025_v38 }
  0x71   :  { %v747_v57 = vrot.slane %v740_v49, %v1025_v38 }
  0x73   :  { %v749_v23 = vadd.f32 %v867_v26, %v747_v57 }
  0x75   :  { %v786_v13 = vadd.f32 %v784_v30, %v749_v23 }
  0x77   :  { %878 = vst.msk [vmem:[%s1476_s3 + $0xb] ss:$4 sm:$0x3] %vm1109_vm1, %v786_v13 }

</bundles_post_ra>
